<compile_context>
chip_gen: v6e
topology: v6e:2x2x1
jax: 0.10.0
libtpu: 0.0.40
codegen_flags: <defaults>
</compile_context>

<pallas_src>
import jax
import jax.numpy as jnp
from jax.experimental import pallas as pl
from jax.experimental.pallas import tpu as pltpu

_MIN_CHUNK_BYTES = 1 << 20  # only split when each chunk is >= 1 MiB


def _identity_dma_kernel(x_hbm, o_hbm, sem):
    # Single whole-array HBM -> HBM DMA (works for any shape / dtype / size).
    cp = pltpu.make_async_copy(x_hbm, o_hbm, sem)
    cp.start()
    cp.wait()


def _make_chunked_dma_kernel(num_chunks, chunk_rows):
    # Split the copy along the leading dim into `num_chunks` equal slices.
    # All DMAs are issued first (so multiple DMA engines can overlap), then
    # waited together.  All indices are static Python ints.
    def kernel(x_hbm, o_hbm, sems):
        copies = []
        for i in range(num_chunks):
            sl = pl.ds(i * chunk_rows, chunk_rows)
            copies.append(
                pltpu.make_async_copy(x_hbm.at[sl], o_hbm.at[sl], sems.at[i])
            )
        for cp in copies:
            cp.start()
        for cp in copies:
            cp.wait()

    return kernel


def _pick_chunking(shape, itemsize, n):
    """Choose (num_chunks, rows_per_chunk) splitting along the leading dim.

    Only splits when: the array has >= 2 dims, the leading dim divides evenly,
    each chunk is >= 1 MiB, and (for 2-D arrays, where the leading dim is the
    sublane dim) chunk boundaries stay on 32-row multiples so every dtype's
    sublane packing (f32:8 / bf16:16 / int8,fp8:32) remains tile-aligned.
    """
    if len(shape) < 2 or shape[0] < 2:
        return 1, 0
    lead = shape[0]
    for c in (8, 4, 2):
        if lead % c:
            continue
        rows = lead // c
        if (n // c) * itemsize < _MIN_CHUNK_BYTES:
            continue
        if len(shape) == 2 and rows % 32:
            continue
        return c, rows
    return 1, 0


def identity_quan_forward(x):
    """IdentityQuan.forward(x) -> x, implemented as an HBM->HBM DMA copy.

    Bit-exact with `return x`.  Production code holding a donated buffer
    should just return x and skip the kernel; this is the benchmark artifact.
    """
    if x.size == 0:
        return x

    n = x.size
    itemsize = jnp.dtype(x.dtype).itemsize
    cost = pl.CostEstimate(
        flops=0, transcendentals=0, bytes_accessed=2 * n * itemsize
    )
    hbm_spec = pl.BlockSpec(memory_space=pl.ANY)

    num_chunks, chunk_rows = _pick_chunking(x.shape, itemsize, n)

    if num_chunks == 1:
        # One whole-array DMA; handles any shape / dtype with zero reshapes.
        return pl.pallas_call(
            _identity_dma_kernel,
            out_shape=jax.ShapeDtypeStruct(x.shape, x.dtype),
            in_specs=[hbm_spec],
            out_specs=hbm_spec,
            scratch_shapes=[pltpu.SemaphoreType.DMA(())],
            cost_estimate=cost,
        )(x)

    return pl.pallas_call(
        _make_chunked_dma_kernel(num_chunks, chunk_rows),
        out_shape=jax.ShapeDtypeStruct(x.shape, x.dtype),
        in_specs=[hbm_spec],
        out_specs=hbm_spec,
        scratch_shapes=[pltpu.SemaphoreType.DMA((num_chunks,))],
        cost_estimate=cost,
    )(x)


if __name__ == "__main__":
    # IdentityQuan(bit=None) has no parameters; nothing to initialize.
    key = jax.random.PRNGKey(0)

    # Small NCHW activation -> single whole-array DMA path.
    x = jax.random.normal(key, (2, 4, 16, 16), dtype=jnp.float32)
    y = identity_quan_forward(x)
    jax.block_until_ready(y)
    assert y.shape == x.shape and y.dtype == x.dtype
    assert bool(jnp.all(y == x))

    # Larger, non-128-divisible-in-the-middle tensor (~8 MiB bf16) -> chunked
    # multi-DMA path (8 chunks along the leading dim).
    x2 = jax.random.normal(jax.random.PRNGKey(1), (8, 513, 1024), dtype=jnp.bfloat16)
    y2 = identity_quan_forward(x2)
    jax.block_until_ready(y2)
    assert y2.shape == x2.shape and y2.dtype == x2.dtype
    assert bool(jnp.all(y2 == x2))

    print("KERNEL_OK")
</pallas_src>

<mosaic_0001>
module attributes {stable_mosaic.version = 11 : i64} {
  func.func @_identity_dma_kernel(%arg0: memref<2x4x16x16xf32, #tpu.memory_space<any>>, %arg1: memref<2x4x16x16xf32, #tpu.memory_space<any>>, %arg2: memref<!tpu.dma_semaphore, #tpu.memory_space<semaphore_mem>>) attributes {dimension_semantics = [], scalar_prefetch = 0 : i64, scratch_operands = 1 : i64, tpu.core_type = #tpu.core_type<tc>} {
    tpu.enqueue_dma source(%arg0 : memref<2x4x16x16xf32, #tpu.memory_space<any>>) target(%arg1 : memref<2x4x16x16xf32, #tpu.memory_space<any>>) target_semaphore(%arg2 : memref<!tpu.dma_semaphore, #tpu.memory_space<semaphore_mem>>)
    tpu.wait_dma2 semaphore(%arg2 : memref<!tpu.dma_semaphore, #tpu.memory_space<semaphore_mem>>) src(%arg0 : memref<2x4x16x16xf32, #tpu.memory_space<any>>) dst(%arg1 : memref<2x4x16x16xf32, #tpu.memory_space<any>>)
    return
  }
}

</mosaic_0001>

<bundles_post_ra>
// kernel: tpu_custom_call.1
= control target key start
LH: loop header
LB: loop body
LE: loop exit
PB: predicated region body
PF: predicated region fallthrough
CT: control target
= control target key end

     0   :  { %s30_s6 = smov [#allocation2]   ;;  %s31_s7 = smov 131072   ;;  %s49_s0 = inlined_call_operand.hbm [shape: f32[2,4,16,16], index: 0, kind: input, shape index: {}]   ;;  %s50_s1 = inlined_call_operand.hbm [shape: f32[2,4,16,16], index: 1, kind: output, shape index: {}]  }
   0x1   :  { %s32_s8 = smov 0  }
   0x2   :  { %12 = dma.general %s49_s0, 2048, %s50_s1, %s30_s6, %s31_s7, [#allocation4], %s32_s8, 0  }
   0x3   :  { %28 = dma.done.wait [#allocation2], 2048 }
   0x4   :  { %29 = vsyncadd [#allocation2], 4294965248 }
   0x5   :  { %18 = vsyncmov [#allocation2] }
   0x8   :  { %s19_s13 = vpop.sfrf %18 }
   0x9   :  { %p24_p0 = scmp.ne.s32.totalorder %s19_s13, 0 }
   0xb   :  { %23 = shalt.err (%p24_p0)  }

</bundles_post_ra>
